<compile_context>
chip_gen: v7x
topology: tpu7x:2x2x1
jax: 0.10.0
libtpu: 0.0.40
codegen_flags: <defaults>
</compile_context>

<pallas_src>
import math

import jax
import jax.numpy as jnp
from jax.experimental import pallas as pl
from jax.experimental.pallas import tpu as pltpu

LANE = 128


def _round_up(n, m=LANE):
    return ((n + m - 1) // m) * m


def _pick_calls_per_step(n_calls, batch, target_rows=256):
    """Pick how many independent calls to process per grid step (M ~ 256 rows)."""
    g = max(1, min(n_calls, target_rows // max(batch, 1)))
    while n_calls % g:
        g -= 1
    return g


def _make_classify_kernel(batch, hidden_pad, class_pad, class_size):
    """One grid step: 3 matmuls over G*batch rows, then per-call dim-0 softmax."""

    def kernel(x_ref, w1_ref, b_ref, w2_ref, w3_ref, o_ref):
        biases = b_ref[...]                         # (3, BW) f32, stacked biases
        b1 = biases[0:1, :hidden_pad]
        b2 = biases[1:2, :hidden_pad]
        b3 = biases[2:3, :class_pad]

        x = x_ref[...]                              # (G*B, out_dim) f32

        # linear1 + relu   (out_dim -> Hpad, lane-dense)
        h = jnp.dot(x, w1_ref[...], preferred_element_type=jnp.float32) + b1
        h = jnp.maximum(h, 0.0)
        # linear2 + relu   (Hpad -> Hpad)
        h = jnp.dot(h, w2_ref[...], preferred_element_type=jnp.float32) + b2
        h = jnp.maximum(h, 0.0)
        # linear3 (logits) (Hpad -> Cpad)
        z = jnp.dot(h, w3_ref[...], preferred_element_type=jnp.float32) + b3

        # softmax over dim=0 of EACH independent call (group of `batch` rows).
        n_groups = x_ref.shape[0] // batch          # static, small -> unrolled
        for g in range(n_groups):
            zg = z[g * batch:(g + 1) * batch, :]    # (B, Cpad) = one vreg slab
            m = jnp.max(zg, axis=0, keepdims=True)
            p = jnp.exp(zg - m)
            denom = jnp.sum(p, axis=0, keepdims=True)
            # exact reciprocal: approx=True would break the 1e-5 tolerance
            pg = p * pl.reciprocal(denom, approx=False)
            # store only the real class columns -> no post-kernel slice needed
            o_ref[g * batch:(g + 1) * batch, :] = pg[:, :class_size]

    return kernel


def classify_forward_stacked(x_stacked, padded_params, class_size,
                             calls_per_step=None):
    """N independent Classify.forward calls in ONE launch.

    x_stacked: (N, B, out_dim) f32; softmax is over each call's own dim 0.
    Returns (N, B, class_size).
    """
    w1, b_stack, w2, w3 = padded_params
    n_calls, batch, out_dim = x_stacked.shape
    h_pad = w1.shape[1]
    c_pad = w3.shape[1]

    if calls_per_step is None:
        calls_per_step = _pick_calls_per_step(n_calls, batch)
    assert n_calls % calls_per_step == 0, "n_calls must be divisible by calls_per_step"
    steps = n_calls // calls_per_step
    rows = calls_per_step * batch

    kernel = _make_classify_kernel(batch, h_pad, c_pad, class_size)

    total_rows = n_calls * batch
    flops = 2 * total_rows * (out_dim * h_pad + h_pad * h_pad + h_pad * c_pad)
    transcendentals = total_rows * c_pad
    bytes_accessed = 4 * (x_stacked.size + w1.size + b_stack.size + w2.size
                          + w3.size + total_rows * class_size)
    cost = pl.CostEstimate(flops=int(flops),
                           transcendentals=int(transcendentals),
                           bytes_accessed=int(bytes_accessed))

    x2d = x_stacked.reshape(total_rows, out_dim)    # leading-dim merge, free

    if steps == 1:
        # Whole problem in one invocation: skip the grid/pipeline machinery.
        vmem = pl.BlockSpec(memory_space=pltpu.MemorySpace.VMEM)
        out2d = pl.pallas_call(
            kernel,
            out_shape=jax.ShapeDtypeStruct((total_rows, class_size), jnp.float32),
            in_specs=[vmem] * 5,
            out_specs=vmem,
            cost_estimate=cost,
        )(x2d, w1, b_stack, w2, w3)
    else:
        out2d = pl.pallas_call(
            kernel,
            out_shape=jax.ShapeDtypeStruct((total_rows, class_size), jnp.float32),
            grid=(steps,),
            in_specs=[
                pl.BlockSpec((rows, out_dim), lambda i: (i, 0)),
                # constant index_map -> weights/biases DMA'd once, VMEM-resident
                pl.BlockSpec((out_dim, h_pad), lambda i: (0, 0)),
                pl.BlockSpec(b_stack.shape, lambda i: (0, 0)),
                pl.BlockSpec((h_pad, h_pad), lambda i: (0, 0)),
                pl.BlockSpec((h_pad, c_pad), lambda i: (0, 0)),
            ],
            out_specs=pl.BlockSpec((rows, class_size), lambda i: (i, 0)),
            compiler_params=pltpu.CompilerParams(
                dimension_semantics=("parallel",)),   # v7x: shard across 2 TCs
            cost_estimate=cost,
        )(x2d, w1, b_stack, w2, w3)

    return out2d.reshape(n_calls, batch, class_size)


def classify_forward(x, padded_params, class_size):
    """Single Classify.forward: x (B, out_dim) -> (B, class_size), softmax over dim=0."""
    return classify_forward_stacked(x[None], padded_params, class_size,
                                    calls_per_step=1)[0]


def xavier_uniform(key, fan_in, fan_out, gain=1.0):
    # matches torch.nn.init.xavier_uniform_ (gain=1)
    bound = gain * math.sqrt(6.0 / (fan_in + fan_out))
    # stored as (in, out) so the kernel computes x @ W (== torch's x @ W.T)
    return jax.random.uniform(key, (fan_in, fan_out), jnp.float32, -bound, bound)


def init_params(key, out_dim, hidden_dim, class_size):
    """Logical (unpadded) parameters, identical to the PyTorch module."""
    k1, k2, k3 = jax.random.split(key, 3)
    w1 = xavier_uniform(k1, out_dim, hidden_dim)
    b1 = jnp.zeros((hidden_dim,), jnp.float32)
    w2 = xavier_uniform(k2, hidden_dim, hidden_dim)
    b2 = jnp.zeros((hidden_dim,), jnp.float32)
    w3 = xavier_uniform(k3, hidden_dim, class_size)
    b3 = jnp.zeros((class_size,), jnp.float32)
    return (w1, b1, w2, b2, w3, b3)


def pad_params(params):
    """One-time zero-pad of hidden/class (lane) dims to 128 + stack the biases."""
    w1, b1, w2, b2, w3, b3 = params
    out_dim, hidden = w1.shape
    class_size = w3.shape[1]
    h_pad = _round_up(hidden)
    c_pad = _round_up(class_size)
    bw = max(h_pad, c_pad)

    w1p = jnp.zeros((out_dim, h_pad), jnp.float32).at[:, :hidden].set(w1)
    w2p = jnp.zeros((h_pad, h_pad), jnp.float32).at[:hidden, :hidden].set(w2)
    w3p = jnp.zeros((h_pad, c_pad), jnp.float32).at[:hidden, :class_size].set(w3)
    b_stack = jnp.zeros((3, bw), jnp.float32)
    b_stack = b_stack.at[0, :hidden].set(b1)
    b_stack = b_stack.at[1, :hidden].set(b2)
    b_stack = b_stack.at[2, :class_size].set(b3)
    return (w1p, b_stack, w2p, w3p)


def classify_reference(x, params):
    w1, b1, w2, b2, w3, b3 = params
    h = jnp.maximum(x @ w1 + b1, 0.0)
    h = jnp.maximum(h @ w2 + b2, 0.0)
    z = h @ w3 + b3
    return jax.nn.softmax(z, axis=0)


if __name__ == "__main__":
    batch_size = 8
    out_dim = 16      # Classify.out_dim == MLP inputs_dim
    hidden_dim = 32
    class_size = 8
    n_calls = 8       # stacked independent invocations (amortized launch)

    key = jax.random.PRNGKey(0)
    kx, kp = jax.random.split(key)
    params = init_params(kp, out_dim, hidden_dim, class_size)
    padded_params = pad_params(params)   # one-time lane-dense re-layout

    # --- single-call forward (exact module semantics) -----------------------
    x = jax.random.normal(kx, (batch_size, out_dim), jnp.float32)
    out = jax.block_until_ready(classify_forward(x, padded_params, class_size))
    ref = classify_reference(x, params)
    assert out.shape == (batch_size, class_size)
    assert jnp.allclose(out, ref, atol=1e-5, rtol=1e-5)
    assert jnp.allclose(jnp.sum(out, axis=0), jnp.ones((class_size,)), atol=1e-5)

    # --- stacked forward: N calls, one launch, VMEM-resident weights --------
    xs = jax.random.normal(kx, (n_calls, batch_size, out_dim), jnp.float32)
    outs = jax.block_until_ready(
        classify_forward_stacked(xs, padded_params, class_size, calls_per_step=4))
    refs = jax.vmap(lambda xc: classify_reference(xc, params))(xs)
    assert outs.shape == (n_calls, batch_size, class_size)
    assert jnp.allclose(outs, refs, atol=1e-5, rtol=1e-5)

    print("KERNEL_OK")
</pallas_src>

<mosaic_0001>
module attributes {stable_mosaic.version = 11 : i64} {
  func.func @kernel(%arg0: memref<8x16xf32, #tpu.memory_space<vmem>>, %arg1: memref<16x128xf32, #tpu.memory_space<vmem>>, %arg2: memref<3x128xf32, #tpu.memory_space<vmem>>, %arg3: memref<128x128xf32, #tpu.memory_space<vmem>>, %arg4: memref<128x128xf32, #tpu.memory_space<vmem>>, %arg5: memref<8x8xf32, #tpu.memory_space<vmem>>) attributes {dimension_semantics = [], scalar_prefetch = 0 : i64, scratch_operands = 0 : i64, tpu.core_type = #tpu.core_type<tc>} {
    %c0 = arith.constant 0 : index
    %c0_0 = arith.constant 0 : index
    %0 = vector.load %arg2[%c0, %c0_0] : memref<3x128xf32, #tpu.memory_space<vmem>>, vector<3x128xf32>
    %1 = vector.extract_strided_slice %0 {offsets = [0, 0], sizes = [1, 128], strides = [1, 1]} : vector<3x128xf32> to vector<1x128xf32>
    %2 = vector.extract_strided_slice %0 {offsets = [1, 0], sizes = [1, 128], strides = [1, 1]} : vector<3x128xf32> to vector<1x128xf32>
    %3 = vector.extract_strided_slice %0 {offsets = [2, 0], sizes = [1, 128], strides = [1, 1]} : vector<3x128xf32> to vector<1x128xf32>
    %c0_1 = arith.constant 0 : index
    %c0_2 = arith.constant 0 : index
    %4 = vector.load %arg0[%c0_1, %c0_2] : memref<8x16xf32, #tpu.memory_space<vmem>>, vector<8x16xf32>
    %c0_3 = arith.constant 0 : index
    %c0_4 = arith.constant 0 : index
    %5 = vector.load %arg1[%c0_3, %c0_4] : memref<16x128xf32, #tpu.memory_space<vmem>>, vector<16x128xf32>
    %cst = arith.constant dense<0.000000e+00> : vector<8x128xf32>
    %6 = tpu.matmul %4, %5, %cst {dimension_numbers = #tpu.dot_dimension_numbers<[1], [0], [0], [1], [0, 0, 1, 1], [], []>} : vector<8x16xf32>, vector<16x128xf32>, vector<8x128xf32> -> vector<8x128xf32>
    %7 = vector.broadcast %1 : vector<1x128xf32> to vector<8x128xf32>
    %8 = arith.addf %6, %7 : vector<8x128xf32>
    %cst_5 = arith.constant 0.000000e+00 : f32
    %9 = vector.broadcast %cst_5 : f32 to vector<8x128xf32>
    %10 = arith.maximumf %8, %9 : vector<8x128xf32>
    %c0_6 = arith.constant 0 : index
    %c0_7 = arith.constant 0 : index
    %11 = vector.load %arg3[%c0_6, %c0_7] : memref<128x128xf32, #tpu.memory_space<vmem>>, vector<128x128xf32>
    %cst_8 = arith.constant dense<0.000000e+00> : vector<8x128xf32>
    %12 = tpu.matmul %10, %11, %cst_8 {dimension_numbers = #tpu.dot_dimension_numbers<[1], [0], [0], [1], [0, 0, 1, 1], [], []>} : vector<8x128xf32>, vector<128x128xf32>, vector<8x128xf32> -> vector<8x128xf32>
    %13 = vector.broadcast %2 : vector<1x128xf32> to vector<8x128xf32>
    %14 = arith.addf %12, %13 : vector<8x128xf32>
    %cst_9 = arith.constant 0.000000e+00 : f32
    %15 = vector.broadcast %cst_9 : f32 to vector<8x128xf32>
    %16 = arith.maximumf %14, %15 : vector<8x128xf32>
    %c0_10 = arith.constant 0 : index
    %c0_11 = arith.constant 0 : index
    %17 = vector.load %arg4[%c0_10, %c0_11] : memref<128x128xf32, #tpu.memory_space<vmem>>, vector<128x128xf32>
    %cst_12 = arith.constant dense<0.000000e+00> : vector<8x128xf32>
    %18 = tpu.matmul %16, %17, %cst_12 {dimension_numbers = #tpu.dot_dimension_numbers<[1], [0], [0], [1], [0, 0, 1, 1], [], []>} : vector<8x128xf32>, vector<128x128xf32>, vector<8x128xf32> -> vector<8x128xf32>
    %19 = vector.broadcast %3 : vector<1x128xf32> to vector<8x128xf32>
    %20 = arith.addf %18, %19 : vector<8x128xf32>
    %cst_13 = arith.constant dense<0xFF800000> : vector<128xf32>
    %21 = vector.multi_reduction <maximumf>, %20, %cst_13 [0] : vector<8x128xf32> to vector<128xf32>
    %22 = vector.shape_cast %21 : vector<128xf32> to vector<1x128xf32>
    %23 = vector.broadcast %22 : vector<1x128xf32> to vector<8x128xf32>
    %24 = arith.subf %20, %23 : vector<8x128xf32>
    %25 = math.exp %24 : vector<8x128xf32>
    %cst_14 = arith.constant dense<0.000000e+00> : vector<128xf32>
    %26 = vector.multi_reduction <add>, %25, %cst_14 [0] : vector<8x128xf32> to vector<128xf32>
    %27 = vector.shape_cast %26 : vector<128xf32> to vector<1x128xf32>
    %28 = tpu.reciprocal %27 : vector<1x128xf32> -> vector<1x128xf32>
    %29 = vector.broadcast %28 : vector<1x128xf32> to vector<8x128xf32>
    %30 = arith.mulf %25, %29 : vector<8x128xf32>
    %31 = vector.extract_strided_slice %30 {offsets = [0, 0], sizes = [8, 8], strides = [1, 1]} : vector<8x128xf32> to vector<8x8xf32>
    %c0_15 = arith.constant 0 : index
    %c0_16 = arith.constant 0 : index
    %32 = vector.load %arg5[%c0_15, %c0_16] : memref<8x8xf32, #tpu.memory_space<vmem>>, vector<8x8xf32>
    tpu.vector_store %arg5[%c0_15, %c0_16], %31 {strides = array<i32>} : memref<8x8xf32, #tpu.memory_space<vmem>>, vector<8x8xf32>,
    return
  }
}

</mosaic_0001>

<bundles_post_ra>
// kernel: tpu_custom_call.1
= control target key start
LH: loop header
LB: loop body
LE: loop exit
PB: predicated region body
PF: predicated region fallthrough
CT: control target
= control target key end

     0   :  { %10 = vsyncpa [#allocation3], 0  ;;  %s804_s0 = inlined_call_operand.hbm [shape: f32[8,16], index: 0, kind: input, shape index: {}]   ;;  %s805_s1 = inlined_call_operand.hbm [shape: f32[16,128], index: 1, kind: input, shape index: {}]   ;;  %s806_s2 = inlined_call_operand.vmem [shape: f32[3,128], index: 2, kind: input, shape index: {}]   ;;  %s807_s3 = inlined_call_operand.hbm [shape: f32[128,128], index: 3, kind: input, shape index: {}]   ;;  %s808_s4 = inlined_call_operand.hbm [shape: f32[128,128], index: 4, kind: input, shape index: {}]   ;;  %s809_s5 = inlined_call_operand.hbm [shape: f32[8,8], index: 5, kind: output, shape index: {}]  }
   0x1   :  { %11 = vsyncpa [#allocation6], 0 }
   0x2   :  { %12 = vsyncpa [#allocation9], 0 }
   0x3   :  { %13 = vsyncpa [#allocation4], 0  ;;  %s672_s18 = smov [#allocation5]   ;;  %s554_s22 = scalar_lea.hbm %s805_s1, 256 }
   0x4   :  { %s29_s19 = sshll.u32 %s672_s18, 4  ;;  %p555_p0 = scmp.ne.s32.totalorder %s805_s1, %s554_s22  ;;  %s30_s19 = int_to_ptr.vmem [resolvable:$true] %s29_s19 }
   0x5   :  { %p558_p1 = scmp.lt.u32.totalorder %s554_s22, %s805_s1 }
   0x7   :  { %p560_p2 = pnand %p558_p1, %p555_p0 }
   0x9   :  { %563 = shalt.err (!%p560_p2)
}
   0xa   :  { %s564_s27 = scalar_lea.vmem %s30_s19, 256  ;;  %p569_p4 = scmp.lt.s32.totalorder %s30_s19, %s30_s19 }
   0xb   :  { %p565_p3 = scmp.ne.s32.totalorder %s30_s19, %s564_s27  ;;  %p570_p5 = scmp.lt.s32.totalorder %s564_s27, %s564_s27 }
   0xd   :  { %p571_p6 = por %p570_p5, %p569_p4 }
   0xf   :  { %p572_p7 = pnand %p571_p6, %p565_p3 }
  0x11   :  { %575 = shalt.err (!%p572_p7)
}
  0x12   :  { %s673_s28 = smov 128   ;;  %s674_s29 = smov 8  }
  0x13   :  { %35 = dma.hbm_to_vmem [thread:$0]  %s805_s1, 256, %s30_s19, [#allocation6], %s673_s28, %s673_s28, %s674_s29  }
  0x14   :  { %s675_s7 = smov [#allocation2]   ;;  %s676_s9 = smov [#allocation7]  }
  0x15   :  { %s20_s8 = sshll.u32 %s675_s7, 4  ;;  %s43_s10 = sshll.u32 %s676_s9, 4  ;;  %s21_s8 = int_to_ptr.vmem [resolvable:$true] %s20_s8  ;;  %s44_s10 = int_to_ptr.vmem [resolvable:$true] %s43_s10 }
  0x16   :  { %s576_s13 = scalar_lea.hbm %s804_s0, 128 }
  0x17   :  { %p577_p8 = scmp.ne.s32.totalorder %s804_s0, %s576_s13  ;;  %p580_p9 = scmp.lt.u32.totalorder %s576_s13, %s804_s0 }
  0x19   :  { %p582_p10 = pnand %p580_p9, %p577_p8 }
  0x1b   :  { %585 = shalt.err (!%p582_p10)
}
  0x1c   :  { %s586_s1 = scalar_lea.vmem %s21_s8, 128  ;;  %p591_p12 = scmp.lt.s32.totalorder %s21_s8, %s21_s8 }
  0x1d   :  { %p587_p11 = scmp.ne.s32.totalorder %s21_s8, %s586_s1  ;;  %p592_p13 = scmp.lt.s32.totalorder %s586_s1, %s586_s1 }
  0x1f   :  { %p593_p0 = por %p592_p13, %p591_p12 }
  0x21   :  { %p594_p1 = pnand %p593_p0, %p587_p11 }
  0x23   :  { %597 = shalt.err (!%p594_p1)
}
  0x24   :  { %23 = dma.hbm_to_vmem [thread:$0]  %s804_s0, 128, %s21_s8, [#allocation3]  }
  0x25   :  { %s598_s22 = scalar_lea.hbm %s807_s3, 2048 }
  0x26   :  { %p599_p2 = scmp.ne.s32.totalorder %s807_s3, %s598_s22  ;;  %p602_p3 = scmp.lt.u32.totalorder %s598_s22, %s807_s3 }
  0x28   :  { %p604_p4 = pnand %p602_p3, %p599_p2 }
  0x2a   :  { %607 = shalt.err (!%p604_p4)
}
  0x2b   :  { %s608_s27 = scalar_lea.vmem %s44_s10, 2048  ;;  %p613_p6 = scmp.lt.s32.totalorder %s44_s10, %s44_s10 }
  0x2c   :  { %p609_p5 = scmp.ne.s32.totalorder %s44_s10, %s608_s27  ;;  %p614_p7 = scmp.lt.s32.totalorder %s608_s27, %s608_s27 }
  0x2e   :  { %p615_p8 = por %p614_p7, %p613_p6 }
  0x30   :  { %p616_p9 = pnand %p615_p8, %p609_p5 }
  0x32   :  { %619 = shalt.err (!%p616_p9)
}
  0x33   :  { %49 = dma.hbm_to_vmem [thread:$0]  %s807_s3, 2048, %s44_s10, [#allocation6], %s673_s28, %s673_s28, %s674_s29  }
  0x34   :  { %s677_s6 = smov [#allocation8]   ;;  %s620_s11 = scalar_lea.hbm %s808_s4, 2048 }
  0x35   :  { %s55_s7 = sshll.u32 %s677_s6, 4  ;;  %p621_p10 = scmp.ne.s32.totalorder %s808_s4, %s620_s11  ;;  %s56_s7 = int_to_ptr.vmem [resolvable:$true] %s55_s7 }
  0x36   :  { %p624_p11 = scmp.lt.u32.totalorder %s620_s11, %s808_s4 }
  0x38   :  { %p626_p12 = pnand %p624_p11, %p621_p10 }
  0x3a   :  { %629 = shalt.err (!%p626_p12)
}
  0x3b   :  { %s630_s16 = scalar_lea.vmem %s56_s7, 2048  ;;  %p635_p0 = scmp.lt.s32.totalorder %s56_s7, %s56_s7 }
  0x3c   :  { %p631_p13 = scmp.ne.s32.totalorder %s56_s7, %s630_s16  ;;  %p636_p1 = scmp.lt.s32.totalorder %s630_s16, %s630_s16 }
  0x3e   :  { %p637_p2 = por %p636_p1, %p635_p0 }
  0x40   :  { %p638_p3 = pnand %p637_p2, %p631_p13 }
  0x42   :  { %641 = shalt.err (!%p638_p3)
}
  0x43   :  { %61 = dma.hbm_to_vmem [thread:$0]  %s808_s4, 2048, %s56_s7, [#allocation9], %s673_s28, %s673_s28, %s674_s29  }
  0x44   :  { %664 = dma.done.wait [#allocation3], 128  }
  0x45   :  { %665 = vsyncadd [#allocation3], 4294967168 }
  0x46   :  { %666 = dma.done.wait [#allocation6], 2304  }
  0x47   :  { %667 = vsyncadd [#allocation6], 4294964992 }
  0x48   :  { %668 = dma.done.wait [#allocation9], 2048  }
  0x49   :  { %669 = vsyncadd [#allocation9], 4294965248  ;;  %v678_v0 = vmov 0.0|0.0   ;;  %vm679_vm0 = vmmov 0   ;;  %v680_v1 = vmov 0.0   ;;  %v76_v2 = vld [vmem:[#allocation5] sm:$0xff]  ;;  %v78_v51 = vlaneseq }
  0x4a   :  { %489 = vmatprep.subr.bf16.mxu0 %v678_v0  ;;  %416 = vmatprep.mubr.msk.f32.mxu0 %vm679_vm0, %v680_v1  ;;  %v77_v3 = vld [vmem:[#allocation5 + $0x8] sm:$0xff]  ;;  %v157_v5 = vld [vmem:[#allocation7] sm:$0xff]  ;;  %v158_v6 = vld [vmem:[#allocation7 + $0x8] sm:$0xff]  ;;  %vm82_vm1 = vcmask 130048   ;;  %vm355_vm2 = vcmask 64512  }
  0x4b   :  { %492 = vmatprep.subr.bf16.mxu1 %v678_v0  ;;  %451 = vmatprep.mubr.msk.f32.mxu1 %vm679_vm0, %v680_v1  ;;  %v490_v4 = vpack.c.bf16 %v77_v3, %v76_v2  ;;  %v159_v7 = vld [vmem:[#allocation7 + $0x10] sm:$0xff]  ;;  %v493_v8 = vpack.c.bf16 %v158_v6, %v157_v5  ;;  %v160_v9 = vld [vmem:[#allocation7 + $0x18] sm:$0xff]  ;;  %v75_v10 = vld [vmem:[#allocation2] sm:$0xff]  ;;  %v79_v52 = vshrl.u32 %v78_v51, 7 }
  0x4c   :  { %v496_v11 = vpack.c.bf16 %v160_v9, %v159_v7  ;;  %v161_v12 = vld [vmem:[#allocation7 + $0x20] sm:$0xff]  ;;  %v162_v13 = vld [vmem:[#allocation7 + $0x28] sm:$0xff]  ;;  %v163_v15 = vld [vmem:[#allocation7 + $0x30] sm:$0xff] }
  0x4d   :  { %491 = vmatpush3.bf16.msra.mxu0 %v490_v4  ;;  %494 = vmatpush3.bf16.msra.mxu1 %v493_v8  ;;  %v499_v14 = vpack.c.bf16 %v162_v13, %v161_v12  ;;  %v164_v16 = vld [vmem:[#allocation7 + $0x38] sm:$0xff]  ;;  %v165_v18 = vld [vmem:[#allocation7 + $0x40] sm:$0xff]  ;;  %v166_v19 = vld [vmem:[#allocation7 + $0x48] sm:$0xff]  ;;  %v80_v53 = vsub.s32 0, %v79_v52  ;;  %v175_v63 = vsub.s32 1, %v79_v52  ;;  %v266_v5 = vsub.s32 2, %v79_v52 }
  0x4e   :  { %516 = vmatprep.subr.bf16.mxu0 %v678_v0  ;;  %495 = vmatprep.subr.bf16.mxu1 %v678_v0  ;;  %v502_v17 = vpack.c.bf16 %v164_v16, %v163_v15  ;;  %v505_v20 = vpack.c.bf16 %v166_v19, %v165_v18  ;;  %v167_v21 = vld [vmem:[#allocation7 + $0x50] sm:$0xff]  ;;  %v168_v22 = vld [vmem:[#allocation7 + $0x58] sm:$0xff]  ;;  %v169_v24 = vld [vmem:[#allocation7 + $0x60] sm:$0xff] }
  0x4f   :  { %v508_v23 = vpack.c.bf16 %v168_v22, %v167_v21  ;;  %v170_v25 = vld [vmem:[#allocation7 + $0x68] sm:$0xff]  ;;  %v171_v27 = vld [vmem:[#allocation7 + $0x70] sm:$0xff]  ;;  %v172_v28 = vld [vmem:[#allocation7 + $0x78] sm:$0xff] }
  0x50   :  { %417 = vmatmul.mubr.msk.f32.vlgmr.msra.gmra.mrb[0].mxu0 %vm82_vm1, %v75_v10  ;;  %v511_v26 = vpack.c.bf16 %v170_v25, %v169_v24  ;;  %v514_v29 = vpack.c.bf16 %v172_v28, %v171_v27  ;;  %v248_v30 = vld [vmem:[#allocation8] sm:$0xff]  ;;  %v249_v31 = vld [vmem:[#allocation8 + $0x8] sm:$0xff]  ;;  %v250_v32 = vld [vmem:[#allocation8 + $0x10] sm:$0xff] }
  0x51   :  { %486 = vmatprep.mubr.msk.f32.mxu0 %vm679_vm0, %v680_v1  ;;  %497 = vmatpush3.bf16.msra.mxu1 %v496_v11  ;;  %v517_v33 = vpack.c.bf16 %v249_v31, %v248_v30  ;;  %v251_v34 = vld [vmem:[#allocation8 + $0x18] sm:$0xff]  ;;  %v252_v36 = vld [vmem:[#allocation8 + $0x20] sm:$0xff]  ;;  %v253_v37 = vld [vmem:[#allocation8 + $0x28] sm:$0xff] }
  0x52   :  { %498 = vmatprep.subr.bf16.mxu1 %v678_v0  ;;  %v520_v35 = vpack.c.bf16 %v251_v34, %v250_v32  ;;  %v523_v38 = vpack.c.bf16 %v253_v37, %v252_v36  ;;  %v254_v39 = vld [vmem:[#allocation8 + $0x30] sm:$0xff]  ;;  %v255_v40 = vld [vmem:[#allocation8 + $0x38] sm:$0xff]  ;;  %v256_v42 = vld [vmem:[#allocation8 + $0x40] sm:$0xff] }
  0x53   :  { %518 = vmatpush3.bf16.msra.mxu0 %v517_v33  ;;  %v526_v41 = vpack.c.bf16 %v255_v40, %v254_v39  ;;  %v257_v43 = vld [vmem:[#allocation8 + $0x48] sm:$0xff]  ;;  %v258_v45 = vld [vmem:[#allocation8 + $0x50] sm:$0xff]  ;;  %v259_v46 = vld [vmem:[#allocation8 + $0x58] sm:$0xff] }
  0x54   :  { %519 = vmatprep.subr.bf16.mxu0 %v678_v0  ;;  %v529_v44 = vpack.c.bf16 %v257_v43, %v256_v42  ;;  %v532_v47 = vpack.c.bf16 %v259_v46, %v258_v45  ;;  %v260_v48 = vld [vmem:[#allocation8 + $0x60] sm:$0xff]  ;;  %v261_v49 = vld [vmem:[#allocation8 + $0x68] sm:$0xff]  ;;  %v262_v60 = vld [vmem:[#allocation8 + $0x70] sm:$0xff] }
  0x55   :  { %500 = vmatpush3.bf16.msra.mxu1 %v499_v14  ;;  %v535_v50 = vpack.c.bf16 %v261_v49, %v260_v48  ;;  %v74_v54 = vld [vmem:[%s806_s2] sm:$0x7]  ;;  %v263_v61 = vld [vmem:[#allocation8 + $0x78] sm:$0xff]  ;;  %s681_s2 = smov [#allocation10]  }
  0x56   :  { %501 = vmatprep.subr.bf16.mxu1 %v678_v0  ;;  %v81_v55 = vrot.slane %v74_v54, %v80_v53  ;;  %v538_v62 = vpack.c.bf16 %v263_v61, %v262_v60  ;;  %v176_v1 = vrot.slane %v74_v54, %v175_v63  ;;  %v267_v6 = vrot.slane %v74_v54, %v266_v5  ;;  %s363_s29 = sshll.u32 %s681_s2, 4  ;;  %s364_s29 = int_to_ptr.vmem [resolvable:$true] %s363_s29 }
  0x57   :  { %521 = vmatpush3.bf16.msra.mxu0 %v520_v35  ;;  %s642_s17 = scalar_lea.vmem %s364_s29, 128  ;;  %p647_p5 = scmp.lt.s32.totalorder %s364_s29, %s364_s29 }
  0x58   :  { %522 = vmatprep.subr.bf16.mxu0 %v678_v0  ;;  %p643_p4 = scmp.ne.s32.totalorder %s364_s29, %s642_s17  ;;  %p648_p6 = scmp.lt.s32.totalorder %s642_s17, %s642_s17 }
  0x59   :  { %503 = vmatpush3.bf16.msra.mxu1 %v502_v17 }
  0x5a   :  { %504 = vmatprep.subr.bf16.mxu1 %v678_v0  ;;  %p649_p7 = por %p648_p6, %p647_p5 }
  0x5b   :  { %524 = vmatpush3.bf16.msra.mxu0 %v523_v38 }
  0x5c   :  { %525 = vmatprep.subr.bf16.mxu0 %v678_v0  ;;  %p650_p8 = pnand %p649_p7, %p643_p4 }
  0x5d   :  { %506 = vmatpush3.bf16.msra.mxu1 %v505_v20 }
  0x5e   :  { %507 = vmatprep.subr.bf16.mxu1 %v678_v0 }
  0x5f   :  { %527 = vmatpush3.bf16.msra.mxu0 %v526_v41 }
  0x60   :  { %528 = vmatprep.subr.bf16.mxu0 %v678_v0 }
  0x61   :  { %509 = vmatpush3.bf16.msra.mxu1 %v508_v23 }
  0x62   :  { %510 = vmatprep.subr.bf16.mxu1 %v678_v0 }
  0x63   :  { %530 = vmatpush3.bf16.msra.mxu0 %v529_v44 }
  0x64   :  { %531 = vmatprep.subr.bf16.mxu0 %v678_v0 }
  0x65   :  { %512 = vmatpush3.bf16.msra.mxu1 %v511_v26 }
  0x66   :  { %513 = vmatprep.subr.bf16.mxu1 %v678_v0 }
  0x67   :  { %533 = vmatpush3.bf16.msra.mxu0 %v532_v47 }
  0x68   :  { %534 = vmatprep.subr.bf16.mxu0 %v678_v0 }
  0x69   :  { %515 = vmatpush3.bf16.msra.mxu1 %v514_v29 }
  0x6b   :  { %536 = vmatpush3.bf16.msra.mxu0 %v535_v50 }
  0x6c   :  { %537 = vmatprep.subr.bf16.mxu0 %v678_v0 }
  0x6f   :  { %539 = vmatpush3.bf16.msra.mxu0 %v538_v62 }
 0x123   :  { %v152_v56 = vpop.f32.mrb[0].mxu0 }
 0x124   :  { %v153_v57 = vadd.f32 %v152_v56, %v81_v55  ;;  %v418_v58 = vpop.f32.mrb[1].mxu0 }
 0x126   :  { %v156_v59 = vmax.f32 %v153_v57, 0.0 }
 0x128   :  { %452 = vmatmul.mubr.f32.vlgmr.msra.gmra.mrb[0].mxu1 %v156_v59 }
 0x1fb   :  { %v243_v0 = vpop.f32.mrb[0].mxu1 }
 0x1fc   :  { %v244_v2 = vadd.f32 %v243_v0, %v176_v1  ;;  %v453_v3 = vpop.f32.mrb[1].mxu1 }
 0x1fe   :  { %v247_v4 = vmax.f32 %v244_v2, 0.0 }
 0x200   :  { %487 = vmatmul.mubr.f32.vlgmr.msra.gmra.mrb[2].mxu0 %v247_v4 }
 0x2d3   :  { %v334_v7 = vpop.f32.mrb[2].mxu0 }
 0x2d4   :  { %v335_v8 = vadd.f32 %v334_v7, %v267_v6  ;;  %v488_v9 = vpop.f32.mrb[3].mxu0 }
 0x2d6   :  { %v338_v10 = vrot.slane %v335_v8, 4 }
 0x2d8   :  { %v339_v11 = vmax.f32 %v335_v8, %v338_v10 }
 0x2da   :  { %v340_v12 = vrot.slane %v339_v11, 2 }
 0x2dc   :  { %v341_v13 = vmax.f32 %v339_v11, %v340_v12 }
 0x2de   :  { %v342_v14 = vrot.slane %v341_v13, 1 }
 0x2e0   :  { %v343_v15 = vmax.f32 %v341_v13, %v342_v14 }
 0x2e2   :  { %v344_v16 = vsub.f32 %v335_v8, %v343_v15 }
 0x2e4   :  { %v345_v17 = vmul.f32 1.442695, %v344_v16 }
 0x2e6   :  { %550 = vpow2.f32 %v345_v17 }
 0x2f0   :  { %v551_v18 = vpop.eup %550 }
 0x2f1   :  { %v347_v19 = vrot.slane %v551_v18, 4 }
 0x2f3   :  { %v348_v20 = vadd.f32 %v551_v18, %v347_v19 }
 0x2f5   :  { %v349_v21 = vrot.slane %v348_v20, 2 }
 0x2f7   :  { %v350_v22 = vadd.f32 %v349_v21, %v348_v20 }
 0x2f9   :  { %v351_v23 = vrot.slane %v350_v22, 1 }
 0x2fb   :  { %v352_v24 = vadd.f32 %v351_v23, %v350_v22 }
 0x2fd   :  { %552 = vrcp.f32 %v352_v24 }
 0x307   :  { %v553_v25 = vpop.eup %552 }
 0x308   :  { %v354_v26 = vmul.f32 %v553_v25, %v551_v18 }
 0x30a   :  { %356 = vst.msk [vmem:[#allocation10] sm:$0xff] %vm355_vm2, %v354_v26 }
 0x30b   :  { %653 = shalt.err (!%p650_p8)
}
 0x30c   :  { %s654_s19 = scalar_lea.hbm %s809_s5, 128 }
 0x30d   :  { %p655_p9 = scmp.ne.s32.totalorder %s809_s5, %s654_s19  ;;  %p658_p10 = scmp.lt.u32.totalorder %s654_s19, %s809_s5 }
 0x30f   :  { %p660_p11 = pnand %p658_p10, %p655_p9 }
 0x311   :  { %663 = shalt.err (!%p660_p11)
}
 0x312   :  { %366 = dma.vmem_to_hbm [thread:$0]  %s364_s29, 128, %s809_s5, [#allocation4]  }
 0x313   :  { %670 = dma.done.wait [#allocation4], 128  }
 0x314   :  { %671 = vsyncadd [#allocation4], 4294967168 }
 0x315   :  { %370 = vsyncpa [#allocation3], 1 }
 0x316   :  { %371 = vsyncpa [#allocation6], 1 }
 0x317   :  { %372 = vsyncpa [#allocation9], 1 }
 0x318   :  { %373 = vsyncpa [#allocation4], 1 }

</bundles_post_ra>
